<compile_context>
chip_gen: v7x
topology: tpu7x:2x2x1
jax: 0.10.0
libtpu: 0.0.40
codegen_flags: <defaults>
</compile_context>

<pallas_src>
import functools

import jax
import jax.numpy as jnp
import numpy as np
from jax.experimental import pallas as pl
from jax.experimental.pallas import tpu as pltpu

# ---- static configuration (mirrors the PyTorch module's config dict) ----
NUM_TRANS = 4          # config['num_trans']
TRANS_TYPE = "mul"     # config['trans_type'] in {'forward', 'mul', 'residual'}
_LANE = 128


def _round_up(n, m):
    return (n + m - 1) // m * m


def _tab_neutral_ad_kernel(x_ref, w1_ref, w2_ref, ew1_ref, ew2_ref, out_ref,
                           *, num_trans, trans_type):
    """One batch tile of the full forward pass (all K views + original).

    x_ref   : (TB, D)                 f32
    w1_ref  : (D, K*H_T)              bf16  all first transform linears, lane-concat
    w2_ref  : (K*H_T, K*D)            bf16  block-diagonal second transform linears
    ew1_ref : ((K+1)*D, (K+1)*H_E)    bf16  encoder L1 replicated block-diagonally
    ew2_ref : ((K+1)*H_E, OUT_LANES)  bf16  encoder L2 block-diag, zero-padded lanes
    out_ref : (TB, OUT_LANES)         f32   lane-dense, view-major on lanes
    """
    x = x_ref[...]                                               # (TB, D) f32

    # ---- all K transform nets: 2 lane-fused MXU ops (bf16 ops, f32 acc) ----
    h = jnp.maximum(
        jnp.dot(x.astype(jnp.bfloat16), w1_ref[...],
                preferred_element_type=jnp.float32), 0.0)        # (TB, K*H_T)
    masks = jnp.dot(h.astype(jnp.bfloat16), w2_ref[...],
                    preferred_element_type=jnp.float32)          # (TB, K*D)

    x_rep = jnp.tile(x, (1, num_trans))                          # (TB, K*D)
    if trans_type == "forward":
        xt = masks
    elif trans_type == "mul":
        # one sigmoid (EUP) + one multiply (VPU) for all K views, in f32
        xt = jax.nn.sigmoid(masks) * x_rep
    else:  # 'residual'
        xt = masks + x_rep

    # ---- encoder on all K+1 views, lane-major (no sublane restack) ---------
    v_all = jnp.concatenate([x, xt], axis=1)                     # (TB, (K+1)*D)
    he = jnp.maximum(
        jnp.dot(v_all.astype(jnp.bfloat16), ew1_ref[...],
                preferred_element_type=jnp.float32), 0.0)        # (TB, (K+1)*H_E)
    zs = jnp.dot(he.astype(jnp.bfloat16), ew2_ref[...],
                 preferred_element_type=jnp.float32)             # (TB, OUT_LANES)

    # single lane-dense (multiple-of-128) unmasked slab store
    out_ref[...] = zs


def pack_tab_neutral_ad_weights(trans_w1, trans_w2, enc_w1, enc_w2):
    """One-time weight packing (hoisted out of the per-call hot path).

    Returns bf16 MXU operands:
      w1_all  (D, K*H_T)             : first transform linears side by side
      w2_blk  (K*H_T, K*D)           : block-diag second transform linears
      ew1_blk ((K+1)*D, (K+1)*H_E)   : encoder L1 replicated block-diagonally
      ew2_blk ((K+1)*H_E, OUT_LANES) : encoder L2 replicated, zero-padded lanes
    """
    K, D, H_T = trans_w1.shape
    H_E, Z = enc_w2.shape
    n_views = K + 1
    out_lanes = _round_up(n_views * Z, _LANE)

    # all first-layer transform weights lane-concatenated: (D, K*H_T)
    w1_all = jnp.transpose(trans_w1, (1, 0, 2)).reshape(D, K * H_T)

    # block-diagonal second-layer transform weights (off-diag zeros kill
    # cross-transform terms, so one matmul yields every mask_i in lane block i)
    w2_blk = jax.scipy.linalg.block_diag(*[trans_w2[i] for i in range(K)])

    # encoder replicated block-diagonally over the K+1 views so the whole
    # encode stays lane-major inside the kernel (no sublane restack).
    # TODO(synk): for large K / H_E, stop shipping the (K+1)^2-replicated
    # encoder and loop over views instead (footprint & redundant MXU FLOPs
    # scale quadratically; fine at K=4).
    ew1_blk = jax.scipy.linalg.block_diag(*([enc_w1] * n_views))
    ew2_blk = jax.scipy.linalg.block_diag(*([enc_w2] * n_views))
    ew2_blk = jnp.pad(ew2_blk, ((0, 0), (0, out_lanes - n_views * Z)))

    bf = jnp.bfloat16
    return dict(
        w1_all=w1_all.astype(bf), w2_blk=w2_blk.astype(bf),
        ew1_blk=ew1_blk.astype(bf), ew2_blk=ew2_blk.astype(bf),
        num_trans=K, x_dim=D, z_dim=Z, out_lanes=out_lanes)


def tab_neutral_ad(x, packed, *, trans_type=TRANS_TYPE, batch_tile=512):
    """Pallas wrapper.  Returns zs of shape (B, num_trans + 1, z_dim)."""
    B, D = x.shape
    K = packed["num_trans"]
    Z = packed["z_dim"]
    out_lanes = packed["out_lanes"]
    assert D == packed["x_dim"]

    # Batch grid: bounds VMEM at production B, enables DMA/compute pipelining,
    # and with "parallel" semantics lets both v7x TensorCores run.  At the
    # demo B=8 this is a single grid step.  (v6e: prefer larger batch_tile and
    # raise vmem_limit_bytes via pltpu.CompilerParams instead of shrinking it;
    # v5e: mind the 16 MiB default scoped VMEM.)
    tb = B if B <= batch_tile else batch_tile
    b_pad = _round_up(B, tb)
    x_p = jnp.pad(x, ((0, b_pad - B), (0, 0))) if b_pad != B else x
    grid = (b_pad // tb,)

    w1, w2, ew1, ew2 = (packed["w1_all"], packed["w2_blk"],
                        packed["ew1_blk"], packed["ew2_blk"])

    kernel = functools.partial(_tab_neutral_ad_kernel,
                               num_trans=K, trans_type=trans_type)

    zs_flat = pl.pallas_call(
        kernel,
        out_shape=jax.ShapeDtypeStruct((b_pad, out_lanes), jnp.float32),
        grid=grid,
        in_specs=[
            pl.BlockSpec((tb, D), lambda b: (b, 0)),        # x: tiled over batch
            pl.BlockSpec(w1.shape, lambda b: (0, 0)),       # weights stay resident
            pl.BlockSpec(w2.shape, lambda b: (0, 0)),
            pl.BlockSpec(ew1.shape, lambda b: (0, 0)),
            pl.BlockSpec(ew2.shape, lambda b: (0, 0)),
        ],
        out_specs=pl.BlockSpec((tb, out_lanes), lambda b: (b, 0)),
        compiler_params=pltpu.CompilerParams(
            dimension_semantics=("parallel",)),
    )(x_p, w1, w2, ew1, ew2)

    # free wrapper plumbing: strip batch/lane padding, view as (B, K+1, Z)
    return zs_flat[:B, :(K + 1) * Z].reshape(B, K + 1, Z)


# --------------------------- references -------------------------------------
def _reference_f32(x, trans_w1, trans_w2, enc_w1, enc_w2, trans_type=TRANS_TYPE):
    """Pure-JAX f32 reference matching the PyTorch forward semantics."""
    B, D = x.shape
    K = trans_w1.shape[0]
    views = [x]
    for i in range(K):
        mask = jnp.maximum(x @ trans_w1[i], 0.0) @ trans_w2[i]
        if trans_type == "forward":
            views.append(mask)
        elif trans_type == "mul":
            views.append(jax.nn.sigmoid(mask) * x)
        else:
            views.append(mask + x)
    x_cat = jnp.stack(views, axis=1).reshape(-1, D)               # (B*(K+1), D)
    zs = jnp.maximum(x_cat @ enc_w1, 0.0) @ enc_w2                # (B*(K+1), Z)
    return zs.reshape(B, K + 1, enc_w2.shape[1])


def _reference_bf16(x, trans_w1, trans_w2, enc_w1, enc_w2, trans_type=TRANS_TYPE):
    """Same math with the kernel's bf16-operand / f32-accumulate dots."""
    bf = jnp.bfloat16
    dot = lambda a, b: jnp.dot(a.astype(bf), b.astype(bf),
                               preferred_element_type=jnp.float32)
    B, D = x.shape
    K = trans_w1.shape[0]
    views = [x]
    for i in range(K):
        mask = dot(jnp.maximum(dot(x, trans_w1[i]), 0.0), trans_w2[i])
        if trans_type == "forward":
            views.append(mask)
        elif trans_type == "mul":
            views.append(jax.nn.sigmoid(mask) * x)
        else:
            views.append(mask + x)
    x_cat = jnp.stack(views, axis=1).reshape(-1, D)
    zs = dot(jnp.maximum(dot(x_cat, enc_w1), 0.0), enc_w2)
    return zs.reshape(B, K + 1, enc_w2.shape[1])


if __name__ == "__main__":
    # small, module-consistent shapes
    B = 8        # batch
    D = 16       # x_dim (< 32  ->  z_dim = 2 * x_dim = 32)
    H_T = 32     # hidden width of each transformation net
    H_E = 64     # hidden width of the encoder
    Z = 2 * D    # latent_dim per the module's fallback rule
    K = NUM_TRANS

    key = jax.random.PRNGKey(0)
    kx, k1, k2, k3, k4 = jax.random.split(key, 5)

    x = jax.random.normal(kx, (B, D), dtype=jnp.float32)
    trans_w1 = 0.2 * jax.random.normal(k1, (K, D, H_T), dtype=jnp.float32)
    trans_w2 = 0.2 * jax.random.normal(k2, (K, H_T, D), dtype=jnp.float32)
    enc_w1 = 0.2 * jax.random.normal(k3, (D, H_E), dtype=jnp.float32)
    enc_w2 = 0.2 * jax.random.normal(k4, (H_E, Z), dtype=jnp.float32)

    # pack weights once (hoisted out of the per-call path)
    packed = pack_tab_neutral_ad_weights(trans_w1, trans_w2, enc_w1, enc_w2)

    zs = tab_neutral_ad(x, packed)
    zs = jax.block_until_ready(zs)
    assert zs.shape == (B, K + 1, Z)

    # tight check vs a reference using identical bf16-operand / f32-acc dots
    zs_bf = _reference_bf16(x, trans_w1, trans_w2, enc_w1, enc_w2)
    np.testing.assert_allclose(np.asarray(zs), np.asarray(zs_bf),
                               rtol=2e-3, atol=2e-3)

    # loose check vs the pure-f32 PyTorch-equivalent reference
    # (difference is only bf16 quantization of MXU operands)
    zs_f32 = _reference_f32(x, trans_w1, trans_w2, enc_w1, enc_w2)
    np.testing.assert_allclose(np.asarray(zs), np.asarray(zs_f32),
                               rtol=6e-2, atol=6e-2)

    print("KERNEL_OK")
</pallas_src>

<mosaic_0001>
module attributes {stable_mosaic.version = 11 : i64} {
  func.func @_tab_neutral_ad_kernel(%arg0: i32, %arg1: memref<8x16xf32, #tpu.memory_space<vmem>>, %arg2: memref<16x128xbf16, #tpu.memory_space<vmem>>, %arg3: memref<128x64xbf16, #tpu.memory_space<vmem>>, %arg4: memref<80x320xbf16, #tpu.memory_space<vmem>>, %arg5: memref<320x256xbf16, #tpu.memory_space<vmem>>, %arg6: memref<8x256xf32, #tpu.memory_space<vmem>>) attributes {dimension_semantics = [#tpu.dimension_semantics<parallel>], iteration_bounds = array<i64: 1>, scalar_prefetch = 0 : i64, scratch_operands = 0 : i64, tpu.core_type = #tpu.core_type<tc>, window_params = [{transform_indices = @transform_0, window_bounds = array<i64: 8, 16>}, {pipeline_mode = #tpu.pipeline_mode<synchronous>, transform_indices = @transform_1, window_bounds = array<i64: 16, 128>}, {pipeline_mode = #tpu.pipeline_mode<synchronous>, transform_indices = @transform_2, window_bounds = array<i64: 128, 64>}, {pipeline_mode = #tpu.pipeline_mode<synchronous>, transform_indices = @transform_3, window_bounds = array<i64: 80, 320>}, {pipeline_mode = #tpu.pipeline_mode<synchronous>, transform_indices = @transform_4, window_bounds = array<i64: 320, 256>}, {transform_indices = @transform_5, window_bounds = array<i64: 8, 256>}]} {
    %c0 = arith.constant 0 : index
    %c0_0 = arith.constant 0 : index
    %0 = vector.load %arg1[%c0, %c0_0] : memref<8x16xf32, #tpu.memory_space<vmem>>, vector<8x16xf32>
    %1 = arith.truncf %0 : vector<8x16xf32> to vector<8x16xbf16>
    %c0_1 = arith.constant 0 : index
    %c0_2 = arith.constant 0 : index
    %2 = vector.load %arg2[%c0_1, %c0_2] : memref<16x128xbf16, #tpu.memory_space<vmem>>, vector<16x128xbf16>
    %cst = arith.constant dense<0.000000e+00> : vector<8x128xf32>
    %3 = tpu.matmul %1, %2, %cst {dimension_numbers = #tpu.dot_dimension_numbers<[1], [0], [0], [1], [0, 0, 1, 1], [], []>} : vector<8x16xbf16>, vector<16x128xbf16>, vector<8x128xf32> -> vector<8x128xf32>
    %cst_3 = arith.constant 0.000000e+00 : f32
    %4 = vector.broadcast %cst_3 : f32 to vector<8x128xf32>
    %5 = arith.maximumf %3, %4 : vector<8x128xf32>
    %6 = arith.truncf %5 : vector<8x128xf32> to vector<8x128xbf16>
    %c0_4 = arith.constant 0 : index
    %c0_5 = arith.constant 0 : index
    %7 = vector.load %arg3[%c0_4, %c0_5] : memref<128x64xbf16, #tpu.memory_space<vmem>>, vector<128x64xbf16>
    %cst_6 = arith.constant dense<0.000000e+00> : vector<8x64xf32>
    %8 = tpu.matmul %6, %7, %cst_6 {dimension_numbers = #tpu.dot_dimension_numbers<[1], [0], [0], [1], [0, 0, 1, 1], [], []>} : vector<8x128xbf16>, vector<128x64xbf16>, vector<8x64xf32> -> vector<8x64xf32>
    %9 = tpu.concatenate %0, %0, %0, %0 in 1 : vector<8x16xf32>, vector<8x16xf32>, vector<8x16xf32>, vector<8x16xf32> -> vector<8x64xf32>
    %10 = arith.negf %8 : vector<8x64xf32>
    %11 = math.exp %10 : vector<8x64xf32>
    %cst_7 = arith.constant 1.000000e+00 : f32
    %12 = vector.broadcast %cst_7 : f32 to vector<8x64xf32>
    %13 = arith.addf %12, %11 : vector<8x64xf32>
    %14 = arith.divf %12, %13 : vector<8x64xf32>
    %15 = arith.mulf %14, %9 : vector<8x64xf32>
    %16 = tpu.concatenate %0, %15 in 1 : vector<8x16xf32>, vector<8x64xf32> -> vector<8x80xf32>
    %17 = arith.truncf %16 : vector<8x80xf32> to vector<8x80xbf16>
    %c0_8 = arith.constant 0 : index
    %c0_9 = arith.constant 0 : index
    %18 = vector.load %arg4[%c0_8, %c0_9] : memref<80x320xbf16, #tpu.memory_space<vmem>>, vector<80x320xbf16>
    %cst_10 = arith.constant dense<0.000000e+00> : vector<8x320xf32>
    %19 = tpu.matmul %17, %18, %cst_10 {dimension_numbers = #tpu.dot_dimension_numbers<[1], [0], [0], [1], [0, 0, 1, 1], [], []>} : vector<8x80xbf16>, vector<80x320xbf16>, vector<8x320xf32> -> vector<8x320xf32>
    %cst_11 = arith.constant 0.000000e+00 : f32
    %20 = vector.broadcast %cst_11 : f32 to vector<8x320xf32>
    %21 = arith.maximumf %19, %20 : vector<8x320xf32>
    %22 = arith.truncf %21 : vector<8x320xf32> to vector<8x320xbf16>
    %c0_12 = arith.constant 0 : index
    %c0_13 = arith.constant 0 : index
    %23 = vector.load %arg5[%c0_12, %c0_13] : memref<320x256xbf16, #tpu.memory_space<vmem>>, vector<320x256xbf16>
    %cst_14 = arith.constant dense<0.000000e+00> : vector<8x256xf32>
    %24 = tpu.matmul %22, %23, %cst_14 {dimension_numbers = #tpu.dot_dimension_numbers<[1], [0], [0], [1], [0, 0, 1, 1], [], []>} : vector<8x320xbf16>, vector<320x256xbf16>, vector<8x256xf32> -> vector<8x256xf32>
    %c0_15 = arith.constant 0 : index
    %c0_16 = arith.constant 0 : index
    %25 = vector.load %arg6[%c0_15, %c0_16] : memref<8x256xf32, #tpu.memory_space<vmem>>, vector<8x256xf32>
    tpu.vector_store %arg6[%c0_15, %c0_16], %24 {strides = array<i32>} : memref<8x256xf32, #tpu.memory_space<vmem>>, vector<8x256xf32>,
    return
  }
  func.func @transform_0(%arg0: i32) -> (i32, i32) {
    %c0_i32 = arith.constant 0 : i32
    %c0_i32_0 = arith.constant 0 : i32
    return %arg0, %c0_i32 : i32, i32
  }
  func.func @transform_1(%arg0: i32) -> (i32, i32) {
    %c0_i32 = arith.constant 0 : i32
    %c0_i32_0 = arith.constant 0 : i32
    %c0_i32_1 = arith.constant 0 : i32
    return %c0_i32, %c0_i32_0 : i32, i32
  }
  func.func @transform_2(%arg0: i32) -> (i32, i32) {
    %c0_i32 = arith.constant 0 : i32
    %c0_i32_0 = arith.constant 0 : i32
    %c0_i32_1 = arith.constant 0 : i32
    return %c0_i32, %c0_i32_0 : i32, i32
  }
  func.func @transform_3(%arg0: i32) -> (i32, i32) {
    %c0_i32 = arith.constant 0 : i32
    %c0_i32_0 = arith.constant 0 : i32
    %c0_i32_1 = arith.constant 0 : i32
    return %c0_i32, %c0_i32_0 : i32, i32
  }
  func.func @transform_4(%arg0: i32) -> (i32, i32) {
    %c0_i32 = arith.constant 0 : i32
    %c0_i32_0 = arith.constant 0 : i32
    %c0_i32_1 = arith.constant 0 : i32
    return %c0_i32, %c0_i32_0 : i32, i32
  }
  func.func @transform_5(%arg0: i32) -> (i32, i32) {
    %c0_i32 = arith.constant 0 : i32
    %c0_i32_0 = arith.constant 0 : i32
    return %arg0, %c0_i32 : i32, i32
  }
}

</mosaic_0001>

<bundles_post_ra>
// kernel: tpu_custom_call.1
= control target key start
LH: loop header
LB: loop body
LE: loop exit
PB: predicated region body
PF: predicated region fallthrough
CT: control target
= control target key end

     0   :  { %10 = vsyncpa [#allocation3], 0  ;;  %s1228_s0 = inlined_call_operand.vmem [shape: f32[8,16], index: 0, kind: input, shape index: {}]   ;;  %s1229_s1 = inlined_call_operand.vmem [shape: bf16[16,128], index: 1, kind: input, shape index: {}]   ;;  %s1230_s2 = inlined_call_operand.vmem [shape: bf16[128,64], index: 2, kind: input, shape index: {}]   ;;  %s1231_s3 = inlined_call_operand.hbm [shape: bf16[80,320], index: 3, kind: input, shape index: {}]   ;;  %s1232_s4 = inlined_call_operand.hbm [shape: bf16[320,256], index: 4, kind: input, shape index: {}]   ;;  %s1233_s5 = inlined_call_operand.hbm [shape: f32[8,256], index: 5, kind: output, shape index: {}]  }
   0x1   :  { %11 = vsyncpa [#allocation6], 0 }
   0x2   :  { %12 = vsyncpa [#allocation4], 0  ;;  %s1081_s18 = smov [#allocation2]   ;;  %s1009_s22 = scalar_lea.hbm %s1231_s3, 1920 }
   0x3   :  { %s24_s19 = sshll.u32 %s1081_s18, 4  ;;  %p1010_p0 = scmp.ne.s32.totalorder %s1231_s3, %s1009_s22  ;;  %s25_s19 = int_to_ptr.vmem [resolvable:$true] %s24_s19 }
   0x4   :  { %p1013_p1 = scmp.lt.u32.totalorder %s1009_s22, %s1231_s3 }
   0x6   :  { %p1015_p2 = pnand %p1013_p1, %p1010_p0 }
   0x8   :  { %1018 = shalt.err (!%p1015_p2)
}
   0x9   :  { %s1019_s27 = scalar_lea.vmem %s25_s19, 1920  ;;  %p1024_p4 = scmp.lt.s32.totalorder %s25_s19, %s25_s19 }
   0xa   :  { %p1020_p3 = scmp.ne.s32.totalorder %s25_s19, %s1019_s27  ;;  %p1025_p5 = scmp.lt.s32.totalorder %s1019_s27, %s1019_s27 }
   0xc   :  { %p1026_p6 = por %p1025_p5, %p1024_p4 }
   0xe   :  { %p1027_p7 = pnand %p1026_p6, %p1020_p3 }
  0x10   :  { %1030 = shalt.err (!%p1027_p7)
}
  0x11   :  { %s1082_s28 = smov 192   ;;  %s1083_s29 = smov 12  }
  0x12   :  { %30 = dma.hbm_to_vmem [thread:$0]  %s1231_s3, 1920, %s25_s19, [#allocation3], %s1082_s28, %s1082_s28, %s1083_s29  }
  0x13   :  { %s1084_s7 = smov [#allocation5]   ;;  %s1031_s11 = scalar_lea.hbm %s1232_s4, 5120 }
  0x14   :  { %s36_s8 = sshll.u32 %s1084_s7, 4  ;;  %p1032_p8 = scmp.ne.s32.totalorder %s1232_s4, %s1031_s11  ;;  %s37_s8 = int_to_ptr.vmem [resolvable:$true] %s36_s8 }
  0x15   :  { %p1035_p9 = scmp.lt.u32.totalorder %s1031_s11, %s1232_s4 }
  0x17   :  { %p1037_p10 = pnand %p1035_p9, %p1032_p8 }
  0x19   :  { %1040 = shalt.err (!%p1037_p10)
}
  0x1a   :  { %s1041_s16 = scalar_lea.vmem %s37_s8, 5120  ;;  %p1046_p12 = scmp.lt.s32.totalorder %s37_s8, %s37_s8 }
  0x1b   :  { %p1042_p11 = scmp.ne.s32.totalorder %s37_s8, %s1041_s16  ;;  %p1047_p13 = scmp.lt.s32.totalorder %s1041_s16, %s1041_s16 }
  0x1d   :  { %p1048_p0 = por %p1047_p13, %p1046_p12 }
  0x1f   :  { %p1049_p1 = pnand %p1048_p0, %p1042_p11 }
  0x21   :  { %1052 = shalt.err (!%p1049_p1)
}
  0x22   :  { %s1085_s3 = smov 128   ;;  %s1086_s17 = smov 8  }
  0x23   :  { %42 = dma.hbm_to_vmem [thread:$0]  %s1232_s4, 5120, %s37_s8, [#allocation6], %s1085_s3, %s1085_s3, %s1086_s17  }
  0x24   :  { %1075 = dma.done.wait [#allocation3], 1920  }
  0x25   :  { %1076 = vsyncadd [#allocation3], 4294965376 }
  0x26   :  { %1077 = dma.done.wait [#allocation6], 5120  }
  0x27   :  { %1078 = vsyncadd [#allocation6], 4294962176  ;;  %v1087_v0 = vmov 0.0   ;;  %vm1088_vm0 = vmmov 0   ;;  %v916_v1 = vld [vmem:[%s1229_s1] sm:$0xff]   ;;  %vm60_vm1 = vcmask 130048  }
  0x28   :  { %859 = vmatprep.subr.bf16.mxu0 %v1087_v0  ;;  %861 = vmatprep.mubr.msk.bf16.mxu0 %vm1088_vm0, %v1087_v0  ;;  %v1157_v2 = vld [vmem:[%s1228_s0] sm:$0xff]  ;;  %v918_v5 = vld [vmem:[%s1230_s2 + $0x8] sm:$0xff]   ;;  %v919_v6 = vld [vmem:[%s1230_s2 + $0x10] sm:$0xff]   ;;  %s1089_s12 = smov 16   ;;  %s1090_s13 = smov 48   ;;  %v1092_v36 = vmov 0  }
  0x29   :  { %860 = vmatpush3.bf16.msra.mxu0 %v916_v1  ;;  %v51_v3 = vpack.c.bf16 %v1157_v2, %v1157_v2  ;;  %v917_v4 = vld [vmem:[%s1230_s2] sm:$0xff]   ;;  %v920_v7 = vld [vmem:[%s1230_s2 + $0x18] sm:$0xff]   ;;  %v922_v9 = vld [vmem:[%s1230_s2 + $0x28] sm:$0xff]   ;;  %211 = vrot.lane.b32.xlu0 %v1157_v2, %s1089_s12  ;;  %s1091_s14 = smov 32   ;;  %vm221_vm2 = vcmask 261120   ;;  %vm223_vm3 = vcmask 392192  }
  0x2a   :  { %865 = vmatprep.subr.bf16.mxu0 %v1087_v0  ;;  %v921_v8 = vld [vmem:[%s1230_s2 + $0x20] sm:$0xff]   ;;  %v923_v10 = vld [vmem:[%s1230_s2 + $0x30] sm:$0xff]   ;;  %v924_v11 = vld [vmem:[%s1230_s2 + $0x38] sm:$0xff]   ;;  %217 = vrot.lane.b32.xlu1 %v1157_v2, %s1090_s13  ;;  %vm338_vm4 = vcmask 654336   ;;  %vm669_vm5 = vcmask 523264   ;;  %s1093_s2 = smov [#allocation7]  }
  0x2b   :  { %v925_v18 = vld [vmem:[#allocation2] ss:$12 sps:$4 sm:$0xff]   ;;  %v927_v19 = vld [vmem:[#allocation2 + $0x4] ss:$12 sps:$4 sm:$0xff]   ;;  %v930_v20 = vld [vmem:[#allocation2 + $0x1c] ss:$12 sps:$4 sm:$0xff]  }
  0x2c   :  { %862 = vmatmul.mubr.msk.bf16.vlgmr.msra.gmra.mrb[0].mxu0 %vm60_vm1, %v51_v3  ;;  %v928_v21 = vld [vmem:[#allocation2 + $0x18] ss:$12 sps:$4 sm:$0xff]   ;;  %v933_v22 = vld [vmem:[#allocation2 + $0x34] ss:$12 sps:$4 sm:$0xff]   ;;  %v931_v23 = vld [vmem:[#allocation2 + $0x30] ss:$12 sps:$4 sm:$0xff]  }
  0x2d   :  { %866 = vmatpush3.bf16.msra.mxu0 %v917_v4  ;;  %881 = vmatprep.mubr.msk.bf16.mxu0 %vm1088_vm0, %v1087_v0  ;;  %v936_v24 = vld [vmem:[#allocation2 + $0x4c] ss:$12 sps:$4 sm:$0xff]   ;;  %v934_v25 = vld [vmem:[#allocation2 + $0x48] ss:$12 sps:$4 sm:$0xff]   ;;  %v939_v26 = vld [vmem:[#allocation2 + $0x64] ss:$12 sps:$4 sm:$0xff]  }
  0x2e   :  { %867 = vmatprep.subr.bf16.mxu0 %v1087_v0  ;;  %214 = vrot.lane.b32.xlu0 %v1157_v2, %s1091_s14  ;;  %v937_v27 = vld [vmem:[#allocation2 + $0x60] ss:$12 sps:$4 sm:$0xff]   ;;  %v945_v44 = vld [vmem:[#allocation5 + $0x4] ss:$8 sps:$4 sm:$0xff]   ;;  %v950_v47 = vld [vmem:[#allocation5 + $0x10] ss:$8 sps:$4 sm:$0xff]  }
  0x2f   :  { %v947_v45 = vld [vmem:[#allocation5] ss:$8 sps:$4 sm:$0xff]   ;;  %v948_v46 = vld [vmem:[#allocation5 + $0x14] ss:$8 sps:$4 sm:$0xff]   ;;  %673 = vmatprep.subr.bf16.mxu1 %v945_v44  ;;  %v951_v48 = vld [vmem:[#allocation5 + $0x24] ss:$8 sps:$4 sm:$0xff]  }
  0x30   :  { %674 = vmatpush1.bf16.msra.mxu1 %v947_v45  ;;  %v953_v49 = vld [vmem:[#allocation5 + $0x20] ss:$8 sps:$4 sm:$0xff]   ;;  %v954_v50 = vld [vmem:[#allocation5 + $0x34] ss:$8 sps:$4 sm:$0xff]   ;;  %v956_v51 = vld [vmem:[#allocation5 + $0x30] ss:$8 sps:$4 sm:$0xff]  }
  0x31   :  { %868 = vmatpush3.bf16.msra.mxu0 %v918_v5  ;;  %675 = vmatprep.subr.bf16.mxu1 %v948_v46  ;;  %v957_v52 = vld [vmem:[#allocation5 + $0x44] ss:$8 sps:$4 sm:$0xff]   ;;  %v959_v53 = vld [vmem:[#allocation5 + $0x40] ss:$8 sps:$4 sm:$0xff]   ;;  %v960_v54 = vld [vmem:[#allocation5 + $0x54] ss:$8 sps:$4 sm:$0xff]  }
  0x32   :  { %869 = vmatprep.subr.bf16.mxu0 %v1087_v0  ;;  %v962_v55 = vld [vmem:[#allocation5 + $0x50] ss:$8 sps:$4 sm:$0xff]   ;;  %v963_v56 = vld [vmem:[#allocation5 + $0x64] ss:$8 sps:$4 sm:$0xff]   ;;  %v965_v57 = vld [vmem:[#allocation5 + $0x60] ss:$8 sps:$4 sm:$0xff]  }
  0x33   :  { %v966_v58 = vld [vmem:[#allocation5 + $0x74] ss:$8 sps:$4 sm:$0xff]   ;;  %v968_v59 = vld [vmem:[#allocation5 + $0x70] ss:$8 sps:$4 sm:$0xff]   ;;  %v969_v60 = vld [vmem:[#allocation5 + $0x84] ss:$8 sps:$4 sm:$0xff]  }
  0x34   :  { %676 = vmatpush1.bf16.msra.mxu1 %v950_v47  ;;  %v971_v61 = vld [vmem:[#allocation5 + $0x80] ss:$8 sps:$4 sm:$0xff]   ;;  %v972_v62 = vld [vmem:[#allocation5 + $0x94] ss:$8 sps:$4 sm:$0xff]   ;;  %v974_v63 = vld [vmem:[#allocation5 + $0x90] ss:$8 sps:$4 sm:$0xff]  }
  0x35   :  { %870 = vmatpush3.bf16.msra.mxu0 %v919_v6  ;;  %677 = vmatprep.subr.bf16.mxu1 %v951_v48  ;;  %v975_v1 = vld [vmem:[#allocation5 + $0xa4] ss:$8 sps:$4 sm:$0xff]   ;;  %v977_v3 = vld [vmem:[#allocation5 + $0xa0] ss:$8 sps:$4 sm:$0xff]   ;;  %v978_v4 = vld [vmem:[#allocation5 + $0xb4] ss:$8 sps:$4 sm:$0xff]  }
  0x36   :  { %871 = vmatprep.subr.bf16.mxu0 %v1087_v0  ;;  %v980_v5 = vld [vmem:[#allocation5 + $0xb0] ss:$8 sps:$4 sm:$0xff]   ;;  %v981_v6 = vld [vmem:[#allocation5 + $0xc4] ss:$8 sps:$4 sm:$0xff]   ;;  %s763_s15 = sshll.u32 %s1093_s2, 4  ;;  %s764_s15 = int_to_ptr.vmem [resolvable:$true] %s763_s15 }
  0x37   :  { %s1053_s16 = scalar_lea.vmem %s764_s15, 256  ;;  %p1058_p3 = scmp.lt.s32.totalorder %s764_s15, %s764_s15 }
  0x38   :  { %678 = vmatpush1.bf16.msra.mxu1 %v953_v49  ;;  %p1054_p2 = scmp.ne.s32.totalorder %s764_s15, %s1053_s16  ;;  %p1059_p4 = scmp.lt.s32.totalorder %s1053_s16, %s1053_s16 }
  0x39   :  { %872 = vmatpush3.bf16.msra.mxu0 %v920_v7  ;;  %679 = vmatprep.subr.bf16.mxu1 %v954_v50  ;;  %v983_v7 = vld [vmem:[#allocation5 + $0xc0] ss:$8 sps:$4 sm:$0xff]  }
  0x3a   :  { %873 = vmatprep.subr.bf16.mxu0 %v1087_v0  ;;  %p1060_p5 = por %p1059_p4, %p1058_p3 }
  0x3c   :  { %680 = vmatpush1.bf16.msra.mxu1 %v956_v51  ;;  %p1061_p6 = pnand %p1060_p5, %p1054_p2 }
  0x3d   :  { %874 = vmatpush3.bf16.msra.mxu0 %v921_v8  ;;  %681 = vmatprep.subr.bf16.mxu1 %v957_v52  ;;  %v984_v8 = vld [vmem:[#allocation5 + $0xd4] ss:$8 sps:$4 sm:$0xff]  }
  0x3e   :  { %875 = vmatprep.subr.bf16.mxu0 %v1087_v0 }
  0x40   :  { %682 = vmatpush1.bf16.msra.mxu1 %v959_v53 }
  0x41   :  { %876 = vmatpush3.bf16.msra.mxu0 %v922_v9  ;;  %683 = vmatprep.subr.bf16.mxu1 %v960_v54  ;;  %v986_v9 = vld [vmem:[#allocation5 + $0xd0] ss:$8 sps:$4 sm:$0xff]  }
  0x42   :  { %877 = vmatprep.subr.bf16.mxu0 %v1087_v0 }
  0x44   :  { %684 = vmatpush1.bf16.msra.mxu1 %v962_v55 }
  0x45   :  { %878 = vmatpush3.bf16.msra.mxu0 %v923_v10  ;;  %685 = vmatprep.subr.bf16.mxu1 %v963_v56  ;;  %v987_v10 = vld [vmem:[#allocation5 + $0xe4] ss:$8 sps:$4 sm:$0xff]  }
  0x46   :  { %879 = vmatprep.subr.bf16.mxu0 %v1087_v0 }
  0x48   :  { %686 = vmatpush1.bf16.msra.mxu1 %v965_v57 }
  0x49   :  { %880 = vmatpush3.bf16.msra.mxu0 %v924_v11  ;;  %687 = vmatprep.subr.bf16.mxu1 %v966_v58 }
  0x4a   :  { %342 = vmatprep.subr.bf16.mxu0 %v927_v19  ;;  %v990_v19 = vld [vmem:[#allocation5 + $0xf4] ss:$8 sps:$4 sm:$0xff]  }
  0x4c   :  { %688 = vmatpush1.bf16.msra.mxu1 %v968_v59 }
  0x4d   :  { %689 = vmatprep.subr.bf16.mxu1 %v969_v60 }
  0x50   :  { %690 = vmatpush1.bf16.msra.mxu1 %v971_v61 }
  0x51   :  { %691 = vmatprep.subr.bf16.mxu1 %v972_v62 }
  0x54   :  { %692 = vmatpush1.bf16.msra.mxu1 %v974_v63 }
  0x55   :  { %693 = vmatprep.subr.bf16.mxu1 %v975_v1 }
  0x58   :  { %694 = vmatpush1.bf16.msra.mxu1 %v977_v3 }
  0x59   :  { %695 = vmatprep.subr.bf16.mxu1 %v978_v4 }
  0x5c   :  { %696 = vmatpush1.bf16.msra.mxu1 %v980_v5 }
  0x5d   :  { %697 = vmatprep.subr.bf16.mxu1 %v981_v6 }
  0x60   :  { %698 = vmatpush1.bf16.msra.mxu1 %v983_v7 }
  0x61   :  { %699 = vmatprep.subr.bf16.mxu1 %v984_v8 }
  0x64   :  { %700 = vmatpush1.bf16.msra.mxu1 %v986_v9 }
  0x65   :  { %701 = vmatprep.subr.bf16.mxu1 %v987_v10 }
  0x9b   :  { %v212_v35 = vpop.permute.xlu0 %211 }
  0x9c   :  { %v220_v37 = vsel %vm60_vm1, %v1157_v2, %v212_v35  ;;  %v218_v40 = vpop.permute.xlu1 %217  ;;  %v1002_v35 = vld [vmem:[#allocation5 + $0x130] ss:$8 sps:$4 sm:$0xff]  }
  0xa0   :  { %v215_v38 = vpop.permute.xlu0 %214 }
  0xa1   :  { %v222_v39 = vsel %vm221_vm2, %v220_v37, %v215_v38 }
  0xa2   :  { %v224_v42 = vsel %vm223_vm3, %v222_v39, %v218_v40 }
  0xff   :  { %v98_v12 = vpop.f32.mrb[0].mxu0 }
 0x100   :  { %v104_v13 = vmax.f32 %v98_v12, 0.0  ;;  %v863_v14 = vpop.f32.mrb[1].mxu0 }
 0x101   :  { %v101_v15 = vpop.f32.mrb[2].mxu0 }
 0x102   :  { %v105_v16 = vpack.c.bf16 %v104_v13, %v104_v13  ;;  %v864_v17 = vpop.f32.mrb[3].mxu0  ;;  %v940_v13 = vld [vmem:[#allocation2 + $0x8] ss:$12 sps:$4 sm:$0xff]   ;;  %v941_v15 = vld [vmem:[#allocation2 + $0x20] ss:$12 sps:$4 sm:$0xff]  }
 0x103   :  { %v943_v17 = vld [vmem:[#allocation2 + $0x50] ss:$12 sps:$4 sm:$0xff]  }
 0x104   :  { %882 = vmatmul.mubr.bf16.vlgmr.msra.gmra.mrb[4].mxu0 %v105_v16  ;;  %v942_v16 = vld [vmem:[#allocation2 + $0x38] ss:$12 sps:$4 sm:$0xff]  }
 0x105   :  { %343 = vmatpush1.bf16.msra.mxu0 %v925_v18  ;;  %374 = vmatprep.mubr.bf16.mxu0 %v1092_v36  ;;  %v989_v18 = vld [vmem:[#allocation5 + $0xe0] ss:$8 sps:$4 sm:$0xff]  }
 0x106   :  { %344 = vmatprep.subr.bf16.mxu0 %v930_v20  ;;  %702 = vmatpush1.bf16.msra.mxu1 %v989_v18  ;;  %v992_v20 = vld [vmem:[#allocation5 + $0xf0] ss:$8 sps:$4 sm:$0xff]  }
 0x107   :  { %703 = vmatprep.subr.bf16.mxu1 %v990_v19 }
 0x109   :  { %345 = vmatpush1.bf16.msra.mxu0 %v928_v21  ;;  %v995_v21 = vld [vmem:[#allocation5 + $0x104] ss:$8 sps:$4 sm:$0xff]  }
 0x10a   :  { %346 = vmatprep.subr.bf16.mxu0 %v933_v22  ;;  %704 = vmatpush1.bf16.msra.mxu1 %v992_v20 }
 0x10b   :  { %714 = vmatprep.subr.bf16.mxu1 %v995_v21 }
 0x10d   :  { %347 = vmatpush1.bf16.msra.mxu0 %v931_v23 }
 0x10e   :  { %348 = vmatprep.subr.bf16.mxu0 %v936_v24 }
 0x111   :  { %349 = vmatpush1.bf16.msra.mxu0 %v934_v25 }
 0x112   :  { %350 = vmatprep.subr.bf16.mxu0 %v939_v26 }
 0x115   :  { %351 = vmatpush1.bf16.msra.mxu0 %v937_v27 }
 0x116   :  { %885 = vmatprep.subr.bf16.mxu0 %v1087_v0 }
 0x1d7   :  { %v204_v28 = vpop.f32.mrb[4].mxu0 }
 0x1d8   :  { %v783_v29 = vmul.f32 -1.442695, %v204_v28  ;;  %v883_v30 = vpop.f32.mrb[5].mxu0 }
 0x1d9   :  { %v207_v31 = vpop.f32.mrb[6].mxu0  ;;  %v998_v30 = vld [vmem:[#allocation5 + $0x114] ss:$8 sps:$4 sm:$0xff]  }
 0x1da   :  { %1005 = vpow2.f32 %v783_v29  ;;  %v884_v32 = vpop.f32.mrb[7].mxu0  ;;  %v993_v29 = vld [vmem:[#allocation5 + $0x100] ss:$8 sps:$4 sm:$0xff]   ;;  %v996_v31 = vld [vmem:[#allocation5 + $0x110] ss:$8 sps:$4 sm:$0xff]  }
 0x1db   :  { %v1001_v32 = vld [vmem:[#allocation5 + $0x124] ss:$8 sps:$4 sm:$0xff]  }
 0x1e4   :  { %v1006_v33 = vpop.eup %1005 }
 0x1e5   :  { %v228_v34 = vadd.f32 1.0, %v1006_v33  ;;  %v999_v33 = vld [vmem:[#allocation5 + $0x120] ss:$8 sps:$4 sm:$0xff]  }
 0x1e7   :  { %1007 = vrcp.f32 %v228_v34  ;;  %v1004_v34 = vld [vmem:[#allocation5 + $0x134] ss:$8 sps:$4 sm:$0xff]  }
 0x1f1   :  { %v1008_v41 = vpop.eup %1007 }
 0x1f2   :  { %v231_v43 = vmul.f32 %v1008_v41, %v224_v42 }
 0x1f4   :  { %233 = vrot.lane.b32.xlu1 %v231_v43, %s1089_s12 }
 0x266   :  { %v234_v11 = vpop.permute.xlu1 %233 }
 0x267   :  { %v236_v12 = vsel %vm60_vm1, %v1157_v2, %v234_v11  ;;  %v944_v2 = vld [vmem:[#allocation2 + $0x68] ss:$12 sps:$4 sm:$0xff]  }
 0x268   :  { %v237_v14 = vpack.c.bf16 %v236_v12, %v236_v12 }
 0x26a   :  { %799 = vmatmul.mubr.msk.bf16.vlgmr.msra.gmra.mrb[8].mxu0 %vm338_vm4, %v237_v14 }
 0x26b   :  { %886 = vmatpush3.bf16.msra.mxu0 %v940_v13  ;;  %895 = vmatprep.mubr.msk.bf16.mxu0 %vm1088_vm0, %v1087_v0 }
 0x26c   :  { %887 = vmatprep.subr.bf16.mxu0 %v1087_v0 }
 0x26f   :  { %888 = vmatpush3.bf16.msra.mxu0 %v941_v15 }
 0x270   :  { %889 = vmatprep.subr.bf16.mxu0 %v1087_v0 }
 0x273   :  { %890 = vmatpush3.bf16.msra.mxu0 %v942_v16 }
 0x274   :  { %891 = vmatprep.subr.bf16.mxu0 %v1087_v0 }
 0x277   :  { %892 = vmatpush3.bf16.msra.mxu0 %v943_v17 }
 0x278   :  { %893 = vmatprep.subr.bf16.mxu0 %v1087_v0 }
 0x27b   :  { %894 = vmatpush3.bf16.msra.mxu0 %v944_v2 }
 0x27e   :  { %896 = vmatmul.mubr.msk.bf16.vlgmr.msra.gmra.mrb[12].mxu0 %vm338_vm4, %v237_v14 }
 0x33d   :  { %v376_v22 = vpop.f32.mrb[8].mxu0 }
 0x33e   :  { %v423_v23 = vmax.f32 %v376_v22, 0.0  ;;  %v378_v24 = vpop.f32.mrb[9].mxu0 }
 0x33f   :  { %v380_v25 = vpop.f32.mrb[10].mxu0  ;;  %v424_v26 = vmax.f32 %v378_v24, 0.0 }
 0x340   :  { %v381_v27 = vpop.f32.mrb[11].mxu0  ;;  %v426_v0 = vpack.c.bf16 %v423_v23, %v423_v23 }
 0x341   :  { %v427_v28 = vpack.c.bf16 %v424_v26, %v424_v26 }
 0x343   :  { %705 = vmatprep.mubr.bf16.mxu1 %v427_v28 }
 0x344   :  { %706 = vmatmul.mubr.bf16.vlgmr.msra.gmra.mrb[0].mxu1 %v426_v0 }
 0x345   :  { %715 = vmatpush1.bf16.msra.mxu1 %v993_v29  ;;  %746 = vmatprep.mubr.bf16.mxu1 %v1092_v36 }
 0x346   :  { %716 = vmatprep.subr.bf16.mxu1 %v998_v30 }
 0x349   :  { %717 = vmatpush1.bf16.msra.mxu1 %v996_v31 }
 0x34a   :  { %718 = vmatprep.subr.bf16.mxu1 %v1001_v32 }
 0x34d   :  { %719 = vmatpush1.bf16.msra.mxu1 %v999_v33 }
 0x34e   :  { %720 = vmatprep.subr.bf16.mxu1 %v1004_v34 }
 0x351   :  { %v417_v37 = vpop.f32.mrb[12].mxu0  ;;  %721 = vmatpush1.bf16.msra.mxu1 %v1002_v35 }
 0x352   :  { %v425_v38 = vmax.f32 %v417_v37, 0.0  ;;  %v897_v39 = vpop.f32.mrb[13].mxu0 }
 0x353   :  { %v420_v40 = vpop.f32.mrb[14].mxu0 }
 0x354   :  { %v428_v41 = vpack.c.bf16 %v425_v38, %v425_v38  ;;  %v898_v42 = vpop.f32.mrb[15].mxu0 }
 0x356   :  { %841 = vmatmul.mubr.msk.bf16.vlgmr.msra.gmra.mrb[0].mxu1 %vm669_vm5, %v428_v41 }
 0x429   :  { %v748_v36 = vpop.f32.mrb[0].mxu1 }
 0x42a   :  { %755 = vst [vmem:[#allocation7] sm:$0xff] %v748_v36  ;;  %v750_v43 = vpop.f32.mrb[1].mxu1 }
 0x42b   :  { %756 = vst [vmem:[#allocation7 + $0x8] sm:$0xff] %v750_v43  ;;  %v752_v44 = vpop.f32.mrb[2].mxu1 }
 0x42c   :  { %v753_v45 = vpop.f32.mrb[3].mxu1 }
 0x42d   :  { %1064 = shalt.err (!%p1061_p6)
}
 0x42e   :  { %s1065_s18 = scalar_lea.hbm %s1233_s5, 256 }
 0x42f   :  { %p1066_p7 = scmp.ne.s32.totalorder %s1233_s5, %s1065_s18  ;;  %p1069_p8 = scmp.lt.u32.totalorder %s1065_s18, %s1233_s5 }
 0x431   :  { %p1071_p9 = pnand %p1069_p8, %p1066_p7 }
 0x433   :  { %1074 = shalt.err (!%p1071_p9)
}
 0x434   :  { %766 = dma.vmem_to_hbm [thread:$0]  %s764_s15, 256, %s1233_s5, [#allocation4]  }
 0x435   :  { %1079 = dma.done.wait [#allocation4], 256  }
 0x436   :  { %1080 = vsyncadd [#allocation4], 4294967040 }
 0x437   :  { %770 = vsyncpa [#allocation3], 1 }
 0x438   :  { %771 = vsyncpa [#allocation6], 1 }
 0x439   :  { %772 = vsyncpa [#allocation4], 1 }

</bundles_post_ra>
